<compile_context>
chip_gen: v5e
topology: v5e:2x2
jax: 0.10.0
libtpu: 0.0.40
codegen_flags: <defaults>
</compile_context>

<pallas_src>
import jax
import jax.numpy as jnp
from jax import lax
from jax.experimental import pallas as pl
from jax.experimental.pallas import tpu as pltpu


def _saplma_kernel(x_ref, w1_ref, b1_ref, w2_ref, b2_ref,
                   w3_ref, b3_ref, w4_ref, b4_ref, o_ref):
    """Whole MLP fused on one batch tile: 3 MXU matmuls + lane-dense epilogue."""
    cdt = w1_ref.dtype  # MXU input dtype (bf16 default, f32 optional)

    # Layer 1: cast the streamed x tile to the MXU dtype *in-kernel* (no extra
    # HBM pass in the wrapper); accumulate in f32, biases/ReLU in f32.
    x = x_ref[...].astype(cdt)
    h = jnp.dot(x, w1_ref[...], preferred_element_type=jnp.float32) + b1_ref[...]
    h = jnp.maximum(h, 0.0)

    h = jnp.dot(h.astype(cdt), w2_ref[...],
                preferred_element_type=jnp.float32) + b2_ref[...]
    h = jnp.maximum(h, 0.0)

    h = jnp.dot(h.astype(cdt), w3_ref[...],
                preferred_element_type=jnp.float32) + b3_ref[...]
    h = jnp.maximum(h, 0.0)                                   # (T, 64) f32

    # Final 64 -> 1 layer, emitted lane-dense: (1,64) x (T,64)^T -> (1,T) row
    # (trans_b dot_general, same pattern as q @ k.T in flash attention), so the
    # store is a lane-major row instead of T masked 1-lane stores.
    z = lax.dot_general(w4_ref[...], h, (((1,), (1,)), ((), ())),
                        preferred_element_type=jnp.float32) + b4_ref[...]
    o_ref[...] = jax.nn.sigmoid(z).astype(o_ref.dtype)


def saplma_forward(x, params, *, batch_tile=512, compute_dtype=jnp.bfloat16,
                   vmem_limit_bytes=None):
    """x: (B, input_size). params: dict of w1..w4 (in,out), b1..b4 (1,out)."""
    B, D = x.shape

    # ---- tile selection (no jnp.pad anywhere) ------------------------------
    # Cap the tile so the double-buffered x stream stays well under v7x's
    # 64 MiB VMEM (weights are resident on top of this).
    bytes_per_row = D * x.dtype.itemsize
    vmem_cap_rows = max(128, ((24 * 1024 * 1024) // (2 * bytes_per_row)) // 128 * 128)
    max_tile = max(128, min(((batch_tile + 127) // 128) * 128, vmem_cap_rows))

    if B <= 256:
        # Tiny batch: one exact full-array tile — no padding, no ragged block.
        tile, num_tiles = B, 1
    else:
        # Multiple-of-128 tiles (keeps the lane-dense output block layout-legal)
        # and at least 2 grid steps so both v7x TensorCores get work; the last
        # x block may be ragged (Pallas masks it; garbage rows only land in
        # output columns >= B, which are sliced off below).
        tile = min(max_tile, ((pl.cdiv(B, 2) + 127) // 128) * 128)
        num_tiles = pl.cdiv(B, tile)
    out_cols = num_tiles * tile

    # ---- VMEM limit: ~112 MiB on v5e/v6e (128 MiB phys), ~56 MiB on v7x ----
    if vmem_limit_bytes is None:
        try:
            phys = int(pltpu.get_tpu_info().vmem_capacity_bytes)
        except Exception:
            phys = 64 * 1024 * 1024
        vmem_limit_bytes = min(112 * 1024 * 1024, (phys * 7) // 8)

    # x stays in its HBM dtype (accept bf16 producers directly for a true 2x
    # HBM saving); the compute-dtype cast happens in-kernel. Weights are tiny,
    # so casting them here is negligible; biases / last layer stay f32.
    w1 = params["w1"].astype(compute_dtype)
    w2 = params["w2"].astype(compute_dtype)
    w3 = params["w3"].astype(compute_dtype)
    b1 = params["b1"].astype(jnp.float32)
    b2 = params["b2"].astype(jnp.float32)
    b3 = params["b3"].astype(jnp.float32)
    w4 = params["w4"].reshape(1, -1).astype(jnp.float32)   # (1, 64) row
    b4 = params["b4"].reshape(1, 1).astype(jnp.float32)

    # Weights/biases: whole-array, single-copy VMEM residents (no per-step DMA,
    # no double-buffering of constant operands).
    vmem_full = lambda: pl.BlockSpec(memory_space=pltpu.MemorySpace.VMEM)

    # TODO(synk): for very large D (f32, D >= ~16k) on v7x, add a D-split grid
    # axis with an f32 layer-1 accumulator instead of only shrinking the tile.
    out = pl.pallas_call(
        _saplma_kernel,
        out_shape=jax.ShapeDtypeStruct((1, out_cols), jnp.float32),
        grid_spec=pltpu.PrefetchScalarGridSpec(
            num_scalar_prefetch=0,
            grid=(num_tiles,),
            in_specs=[
                pl.BlockSpec((tile, D), lambda i: (i, 0)),   # streamed x tile
                vmem_full(), vmem_full(),   # w1, b1
                vmem_full(), vmem_full(),   # w2, b2
                vmem_full(), vmem_full(),   # w3, b3
                vmem_full(), vmem_full(),   # w4 (1,64), b4 (1,1)
            ],
            out_specs=pl.BlockSpec((1, tile), lambda i: (0, i)),
        ),
        compiler_params=pltpu.CompilerParams(
            dimension_semantics=("parallel",),
            vmem_limit_bytes=vmem_limit_bytes,
        ),
    )(x, w1, b1, w2, b2, w3, b3, w4, b4)

    return out[0, :B].reshape(B, 1)


def init_params(key, input_size):
    """Deterministic synthetic init matching the module's layer shapes."""
    dims = [(input_size, 256), (256, 128), (128, 64), (64, 1)]
    params = {}
    keys = jax.random.split(key, 2 * len(dims))
    for idx, (fan_in, fan_out) in enumerate(dims):
        bound = 1.0 / jnp.sqrt(float(fan_in))
        w = jax.random.uniform(keys[2 * idx], (fan_in, fan_out),
                               dtype=jnp.float32, minval=-bound, maxval=bound)
        b = jax.random.uniform(keys[2 * idx + 1], (1, fan_out),
                               dtype=jnp.float32, minval=-bound, maxval=bound)
        params[f"w{idx + 1}"] = w
        params[f"b{idx + 1}"] = b
    return params


def reference_forward(x, params):
    h = jnp.maximum(x @ params["w1"] + params["b1"], 0.0)
    h = jnp.maximum(h @ params["w2"] + params["b2"], 0.0)
    h = jnp.maximum(h @ params["w3"] + params["b3"], 0.0)
    return jax.nn.sigmoid(h @ params["w4"] + params["b4"])


if __name__ == "__main__":
    key = jax.random.PRNGKey(0)
    k_x, k_p = jax.random.split(key)

    batch, input_size = 16, 32
    x = jax.random.normal(k_x, (batch, input_size), dtype=jnp.float32)
    params = init_params(k_p, input_size)
    ref = reference_forward(x, params)

    # f32 MXU path (single full-array tile): exact vs the f32 reference.
    out_f32 = jax.block_until_ready(
        saplma_forward(x, params, compute_dtype=jnp.float32))
    assert out_f32.shape == (batch, 1)
    assert jnp.allclose(out_f32, ref, atol=1e-5, rtol=1e-5), "f32 mismatch"

    # Default path: bf16 MXU inputs (in-kernel cast, f32 accumulation).
    out_bf16 = jax.block_until_ready(saplma_forward(x, params))
    assert out_bf16.shape == (batch, 1)
    assert jnp.allclose(out_bf16, ref, atol=5e-2, rtol=5e-2), "bf16 mismatch"

    # Multi-tile ragged path: 3 tiles of 128 rows, last one ragged — exercises
    # the no-pad / masked-edge-block / lane-dense-output code path.
    batch2 = 300
    x2 = jax.random.normal(jax.random.PRNGKey(1), (batch2, input_size),
                           dtype=jnp.float32)
    ref2 = reference_forward(x2, params)
    out2 = jax.block_until_ready(saplma_forward(x2, params, batch_tile=128))
    assert out2.shape == (batch2, 1)
    assert jnp.allclose(out2, ref2, atol=5e-2, rtol=5e-2), "ragged-tile mismatch"

    print("KERNEL_OK")
</pallas_src>

<mosaic_0001>
module attributes {stable_mosaic.version = 11 : i64} {
  func.func @_saplma_kernel(%arg0: i32, %arg1: memref<16x32xf32, #tpu.memory_space<vmem>>, %arg2: memref<32x256xf32, #tpu.memory_space<vmem>>, %arg3: memref<1x256xf32, #tpu.memory_space<vmem>>, %arg4: memref<256x128xf32, #tpu.memory_space<vmem>>, %arg5: memref<1x128xf32, #tpu.memory_space<vmem>>, %arg6: memref<128x64xf32, #tpu.memory_space<vmem>>, %arg7: memref<1x64xf32, #tpu.memory_space<vmem>>, %arg8: memref<1x64xf32, #tpu.memory_space<vmem>>, %arg9: memref<1x1xf32, #tpu.memory_space<vmem>>, %arg10: memref<1x16xf32, #tpu.memory_space<vmem>>) attributes {dimension_semantics = [#tpu.dimension_semantics<parallel>], iteration_bounds = array<i64: 1>, scalar_prefetch = 0 : i64, scratch_operands = 0 : i64, tpu.core_type = #tpu.core_type<tc>, window_params = [{transform_indices = @transform_0, window_bounds = array<i64: 16, 32>}, {pipeline_mode = #tpu.pipeline_mode<synchronous>, transform_indices = @transform_1, window_bounds = array<i64: 32, 256>}, {pipeline_mode = #tpu.pipeline_mode<synchronous>, transform_indices = @transform_2, window_bounds = array<i64: 1, 256>}, {pipeline_mode = #tpu.pipeline_mode<synchronous>, transform_indices = @transform_3, window_bounds = array<i64: 256, 128>}, {pipeline_mode = #tpu.pipeline_mode<synchronous>, transform_indices = @transform_4, window_bounds = array<i64: 1, 128>}, {pipeline_mode = #tpu.pipeline_mode<synchronous>, transform_indices = @transform_5, window_bounds = array<i64: 128, 64>}, {pipeline_mode = #tpu.pipeline_mode<synchronous>, transform_indices = @transform_6, window_bounds = array<i64: 1, 64>}, {pipeline_mode = #tpu.pipeline_mode<synchronous>, transform_indices = @transform_7, window_bounds = array<i64: 1, 64>}, {pipeline_mode = #tpu.pipeline_mode<synchronous>, transform_indices = @transform_8, window_bounds = array<i64: 1, 1>}, {transform_indices = @transform_9, window_bounds = array<i64: 1, 16>}]} {
    %c0 = arith.constant 0 : index
    %c0_0 = arith.constant 0 : index
    %0 = vector.load %arg1[%c0, %c0_0] : memref<16x32xf32, #tpu.memory_space<vmem>>, vector<16x32xf32>
    %c0_1 = arith.constant 0 : index
    %c0_2 = arith.constant 0 : index
    %1 = vector.load %arg2[%c0_1, %c0_2] : memref<32x256xf32, #tpu.memory_space<vmem>>, vector<32x256xf32>
    %cst = arith.constant dense<0.000000e+00> : vector<16x256xf32>
    %2 = tpu.matmul %0, %1, %cst {dimension_numbers = #tpu.dot_dimension_numbers<[1], [0], [0], [1], [0, 0, 1, 1], [], []>} : vector<16x32xf32>, vector<32x256xf32>, vector<16x256xf32> -> vector<16x256xf32>
    %c0_3 = arith.constant 0 : index
    %c0_4 = arith.constant 0 : index
    %3 = vector.load %arg3[%c0_3, %c0_4] : memref<1x256xf32, #tpu.memory_space<vmem>>, vector<1x256xf32>
    %4 = vector.broadcast %3 : vector<1x256xf32> to vector<16x256xf32>
    %5 = arith.addf %2, %4 : vector<16x256xf32>
    %cst_5 = arith.constant 0.000000e+00 : f32
    %6 = vector.broadcast %cst_5 : f32 to vector<16x256xf32>
    %7 = arith.maximumf %5, %6 : vector<16x256xf32>
    %c0_6 = arith.constant 0 : index
    %c0_7 = arith.constant 0 : index
    %8 = vector.load %arg4[%c0_6, %c0_7] : memref<256x128xf32, #tpu.memory_space<vmem>>, vector<256x128xf32>
    %cst_8 = arith.constant dense<0.000000e+00> : vector<16x128xf32>
    %9 = tpu.matmul %7, %8, %cst_8 {dimension_numbers = #tpu.dot_dimension_numbers<[1], [0], [0], [1], [0, 0, 1, 1], [], []>} : vector<16x256xf32>, vector<256x128xf32>, vector<16x128xf32> -> vector<16x128xf32>
    %c0_9 = arith.constant 0 : index
    %c0_10 = arith.constant 0 : index
    %10 = vector.load %arg5[%c0_9, %c0_10] : memref<1x128xf32, #tpu.memory_space<vmem>>, vector<1x128xf32>
    %11 = vector.broadcast %10 : vector<1x128xf32> to vector<16x128xf32>
    %12 = arith.addf %9, %11 : vector<16x128xf32>
    %cst_11 = arith.constant 0.000000e+00 : f32
    %13 = vector.broadcast %cst_11 : f32 to vector<16x128xf32>
    %14 = arith.maximumf %12, %13 : vector<16x128xf32>
    %c0_12 = arith.constant 0 : index
    %c0_13 = arith.constant 0 : index
    %15 = vector.load %arg6[%c0_12, %c0_13] : memref<128x64xf32, #tpu.memory_space<vmem>>, vector<128x64xf32>
    %cst_14 = arith.constant dense<0.000000e+00> : vector<16x64xf32>
    %16 = tpu.matmul %14, %15, %cst_14 {dimension_numbers = #tpu.dot_dimension_numbers<[1], [0], [0], [1], [0, 0, 1, 1], [], []>} : vector<16x128xf32>, vector<128x64xf32>, vector<16x64xf32> -> vector<16x64xf32>
    %c0_15 = arith.constant 0 : index
    %c0_16 = arith.constant 0 : index
    %17 = vector.load %arg7[%c0_15, %c0_16] : memref<1x64xf32, #tpu.memory_space<vmem>>, vector<1x64xf32>
    %18 = vector.broadcast %17 : vector<1x64xf32> to vector<16x64xf32>
    %19 = arith.addf %16, %18 : vector<16x64xf32>
    %cst_17 = arith.constant 0.000000e+00 : f32
    %20 = vector.broadcast %cst_17 : f32 to vector<16x64xf32>
    %21 = arith.maximumf %19, %20 : vector<16x64xf32>
    %c0_18 = arith.constant 0 : index
    %c0_19 = arith.constant 0 : index
    %22 = vector.load %arg8[%c0_18, %c0_19] : memref<1x64xf32, #tpu.memory_space<vmem>>, vector<1x64xf32>
    %cst_20 = arith.constant dense<0.000000e+00> : vector<1x16xf32>
    %23 = tpu.matmul %22, %21, %cst_20 {dimension_numbers = #tpu.dot_dimension_numbers<[1], [1], [0], [0], [0, 0, 1, 0], [], []>} : vector<1x64xf32>, vector<16x64xf32>, vector<1x16xf32> -> vector<1x16xf32>
    %c0_21 = arith.constant 0 : index
    %c0_22 = arith.constant 0 : index
    %24 = vector.load %arg9[%c0_21, %c0_22] : memref<1x1xf32, #tpu.memory_space<vmem>>, vector<1x1xf32>
    %25 = vector.broadcast %24 : vector<1x1xf32> to vector<1x16xf32>
    %26 = arith.addf %23, %25 : vector<1x16xf32>
    %27 = arith.negf %26 : vector<1x16xf32>
    %28 = math.exp %27 : vector<1x16xf32>
    %cst_23 = arith.constant 1.000000e+00 : f32
    %29 = vector.broadcast %cst_23 : f32 to vector<1x16xf32>
    %30 = arith.addf %29, %28 : vector<1x16xf32>
    %31 = arith.divf %29, %30 : vector<1x16xf32>
    %c0_24 = arith.constant 0 : index
    %c0_25 = arith.constant 0 : index
    %32 = vector.load %arg10[%c0_24, %c0_25] : memref<1x16xf32, #tpu.memory_space<vmem>>, vector<1x16xf32>
    tpu.vector_store %arg10[%c0_24, %c0_25], %31 {strides = array<i32>} : memref<1x16xf32, #tpu.memory_space<vmem>>, vector<1x16xf32>,
    return
  }
  func.func @transform_0(%arg0: i32) -> (i32, i32) {
    %c0_i32 = arith.constant 0 : i32
    %c0_i32_0 = arith.constant 0 : i32
    return %arg0, %c0_i32 : i32, i32
  }
  func.func @transform_1(%arg0: i32) -> (i32, i32) {
    %c0_i32 = arith.constant 0 : i32
    %c0_i32_0 = arith.constant 0 : i32
    %c0_i32_1 = arith.constant 0 : i32
    return %c0_i32, %c0_i32_0 : i32, i32
  }
  func.func @transform_2(%arg0: i32) -> (i32, i32) {
    %c0_i32 = arith.constant 0 : i32
    %c0_i32_0 = arith.constant 0 : i32
    %c0_i32_1 = arith.constant 0 : i32
    return %c0_i32, %c0_i32_0 : i32, i32
  }
  func.func @transform_3(%arg0: i32) -> (i32, i32) {
    %c0_i32 = arith.constant 0 : i32
    %c0_i32_0 = arith.constant 0 : i32
    %c0_i32_1 = arith.constant 0 : i32
    return %c0_i32, %c0_i32_0 : i32, i32
  }
  func.func @transform_4(%arg0: i32) -> (i32, i32) {
    %c0_i32 = arith.constant 0 : i32
    %c0_i32_0 = arith.constant 0 : i32
    %c0_i32_1 = arith.constant 0 : i32
    return %c0_i32, %c0_i32_0 : i32, i32
  }
  func.func @transform_5(%arg0: i32) -> (i32, i32) {
    %c0_i32 = arith.constant 0 : i32
    %c0_i32_0 = arith.constant 0 : i32
    %c0_i32_1 = arith.constant 0 : i32
    return %c0_i32, %c0_i32_0 : i32, i32
  }
  func.func @transform_6(%arg0: i32) -> (i32, i32) {
    %c0_i32 = arith.constant 0 : i32
    %c0_i32_0 = arith.constant 0 : i32
    %c0_i32_1 = arith.constant 0 : i32
    return %c0_i32, %c0_i32_0 : i32, i32
  }
  func.func @transform_7(%arg0: i32) -> (i32, i32) {
    %c0_i32 = arith.constant 0 : i32
    %c0_i32_0 = arith.constant 0 : i32
    %c0_i32_1 = arith.constant 0 : i32
    return %c0_i32, %c0_i32_0 : i32, i32
  }
  func.func @transform_8(%arg0: i32) -> (i32, i32) {
    %c0_i32 = arith.constant 0 : i32
    %c0_i32_0 = arith.constant 0 : i32
    %c0_i32_1 = arith.constant 0 : i32
    return %c0_i32, %c0_i32_0 : i32, i32
  }
  func.func @transform_9(%arg0: i32) -> (i32, i32) {
    %c0_i32 = arith.constant 0 : i32
    %c0_i32_0 = arith.constant 0 : i32
    return %c0_i32, %arg0 : i32, i32
  }
}

</mosaic_0001>

<bundles_post_ra>
// kernel: tpu_custom_call.1
= control target key start
LH: loop header
LB: loop body
LE: loop exit
PB: predicated region body
PF: predicated region fallthrough
CT: control target
= control target key end

     0   :  { %s559_s0 = inlined_call_operand.vmem [shape: f32[16,32], index: 0, kind: input, shape index: {}]   ;;  %s560_s1 = inlined_call_operand.vmem [shape: f32[32,256], index: 1, kind: input, shape index: {}]   ;;  %s561_s2 = inlined_call_operand.vmem [shape: f32[1,256], index: 2, kind: input, shape index: {}]   ;;  %s562_s3 = inlined_call_operand.hbm [shape: f32[256,128], index: 3, kind: input, shape index: {}]   ;;  %s563_s4 = inlined_call_operand.vmem [shape: f32[1,128], index: 4, kind: input, shape index: {}]   ;;  %s564_s5 = inlined_call_operand.vmem [shape: f32[128,64], index: 5, kind: input, shape index: {}]   ;;  %s565_s6 = inlined_call_operand.vmem [shape: f32[1,64], index: 6, kind: input, shape index: {}]   ;;  %s566_s7 = inlined_call_operand.vmem [shape: f32[1,64], index: 7, kind: input, shape index: {}]   ;;  %s567_s8 = inlined_call_operand.<no memory space> [shape: f32[1,1], index: 8, kind: input, shape index: {}]   ;;  %s568_s9 = inlined_call_operand.hbm [shape: f32[1,16], index: 9, kind: output, shape index: {}]  }
   0x1   :  { %v14_v0 = vstv %s567_s8 }
   0x2   :  { %15 = vst [vmem:[#allocation2] sm:$0x1] %v14_v0 }
   0x3   :  { %16 = vsyncpa [#allocation4], 0 }
   0x4   :  { %17 = vsyncpa [#allocation5], 0  ;;  %s28_s13 = sshll.u32 %s562_s3, 4  ;;  %s401_s14 = smov [#allocation3]   ;;  %s29_s13 = int_to_ptr.hbm [resolvable:$true] %s28_s13 }
   0x5   :  { %s30_s15 = sshll.u32 %s401_s14, 4  ;;  %s402_s16 = smov 128   ;;  %s31_s15 = int_to_ptr.vmem [resolvable:$true] %s30_s15 }
   0x6   :  { %s403_s17 = smov 8  }
   0x7   :  { %36 = dma.hbm_to_vmem [thread:$0]  %s29_s13, 4096, %s31_s15, [#allocation4], %s402_s16, %s402_s16, %s403_s17  }
   0x8   :  { %397 = dma.done.wait [#allocation4], 4096  }
   0x9   :  { %398 = vsyncadd [#allocation4], 4294963200  ;;  %v59_v1 = vld [vmem:[%s560_s1 + $0x30] sm:$0xff]  ;;  %v57_v2 = vld [vmem:[%s560_s1 + $0x20] sm:$0xff]  ;;  %vm67_vm0 = vcmask 261120   ;;  %vm261_vm1 = vcmask 523264  }
   0xa   :  { %86 = vmatpush.msra.mxu1 %v59_v1  ;;  %v55_v3 = vld [vmem:[%s560_s1 + $0x10] sm:$0xff]  ;;  %v139_v4 = vld [vmem:[#allocation3 + $0x78] sm:$0xff]  ;;  %v136_v11 = vld [vmem:[#allocation3 + $0x60] sm:$0xff]  ;;  %s319_s24 = sshll.u32 %s568_s9, 4  ;;  %vm310_vm5 = vcmask 122880   ;;  %s320_s24 = int_to_ptr.hbm [resolvable:$true] %s319_s24 }
   0xb   :  { %v138_v5 = vld [vmem:[#allocation3 + $0x70] sm:$0xff]  ;;  %v53_v6 = vld [vmem:[%s560_s1] sm:$0xff]  ;;  %160 = vmatpush.msra.mxu2 %v139_v4  ;;  %v137_v8 = vld [vmem:[#allocation3 + $0x68] sm:$0xff] }
   0xc   :  { %87 = vmatpush.msra.mxu1 %v57_v2  ;;  %v51_v7 = vld [vmem:[%s559_s0] sm:$0xff]  ;;  %v60_v9 = vld [vmem:[%s560_s1 + $0x38] sm:$0xff]  ;;  %v58_v13 = vld [vmem:[%s560_s1 + $0x28] sm:$0xff] }
   0xd   :  { %161 = vmatpush.msra.mxu2 %v138_v5  ;;  %v155_v10 = vld [vmem:[#allocation3 + $0xf8] sm:$0xff]  ;;  %v154_v12 = vld [vmem:[#allocation3 + $0xf0] sm:$0xff]  ;;  %v153_v14 = vld [vmem:[#allocation3 + $0xe8] sm:$0xff] }
   0xe   :  { %88 = vmatpush.msra.mxu1 %v55_v3  ;;  %183 = vmatpush.msra.mxu3 %v155_v10  ;;  %v135_v15 = vld [vmem:[#allocation3 + $0x58] sm:$0xff]  ;;  %v152_v17 = vld [vmem:[#allocation3 + $0xe0] sm:$0xff]  ;;  %v134_v18 = vld [vmem:[#allocation3 + $0x50] sm:$0xff] }
   0xf   :  { %162 = vmatpush.msra.mxu2 %v137_v8  ;;  %v56_v16 = vld [vmem:[%s560_s1 + $0x18] sm:$0xff]  ;;  %v54_v19 = vld [vmem:[%s560_s1 + $0x8] sm:$0xff]  ;;  %v61_v43 = vld [vmem:[%s561_s2] sm:$0x3] }
  0x10   :  { %89 = vmatpush.msra.mxu1 %v53_v6  ;;  %184 = vmatpush.msra.mxu3 %v154_v12  ;;  %v151_v20 = vld [vmem:[#allocation3 + $0xd8] sm:$0xff]  ;;  %v52_v21 = vld [vmem:[%s559_s0 + $0x8] sm:$0xff]  ;;  %v130_v25 = vld [vmem:[#allocation3 + $0x30] sm:$0xff]  ;;  %v63_v44 = vperm.slane %v61_v43, 0  ;;  %v64_v56 = vperm.slane %v61_v43, 1 }
  0x11   :  { %329 = vmatmul.msk.f32.vlgmr.msra.gmra.mxu1 %vm67_vm0, %v51_v7  ;;  %163 = vmatpush.msra.mxu2 %v136_v11  ;;  %v133_v22 = vld [vmem:[#allocation3 + $0x48] sm:$0xff]  ;;  %v132_v23 = vld [vmem:[#allocation3 + $0x40] sm:$0xff]  ;;  %v131_v24 = vld [vmem:[#allocation3 + $0x38] sm:$0xff] }
  0x12   :  { %109 = vmatpush.msrb.mxu1 %v60_v9  ;;  %185 = vmatpush.msra.mxu3 %v153_v14  ;;  %v129_v26 = vld [vmem:[#allocation3 + $0x28] sm:$0xff]  ;;  %v128_v27 = vld [vmem:[#allocation3 + $0x20] sm:$0xff]  ;;  %v127_v28 = vld [vmem:[#allocation3 + $0x18] sm:$0xff] }
  0x13   :  { %164 = vmatpush.msra.mxu2 %v135_v15  ;;  %v126_v29 = vld [vmem:[#allocation3 + $0x10] sm:$0xff]  ;;  %v125_v31 = vld [vmem:[#allocation3 + $0x8] sm:$0xff]  ;;  %v124_v33 = vld [vmem:[#allocation3] sm:$0xff] }
  0x14   :  { %110 = vmatpush.msrb.mxu1 %v58_v13  ;;  %186 = vmatpush.msra.mxu3 %v152_v17  ;;  %v150_v30 = vld [vmem:[#allocation3 + $0xd0] sm:$0xff]  ;;  %v149_v32 = vld [vmem:[#allocation3 + $0xc8] sm:$0xff]  ;;  %v148_v34 = vld [vmem:[#allocation3 + $0xc0] sm:$0xff] }
  0x15   :  { %165 = vmatpush.msra.mxu2 %v134_v18  ;;  %v147_v35 = vld [vmem:[#allocation3 + $0xb8] sm:$0xff]  ;;  %v146_v36 = vld [vmem:[#allocation3 + $0xb0] sm:$0xff]  ;;  %v145_v37 = vld [vmem:[#allocation3 + $0xa8] sm:$0xff] }
  0x16   :  { %111 = vmatpush.msrb.mxu1 %v56_v16  ;;  %187 = vmatpush.msra.mxu3 %v151_v20  ;;  %v144_v38 = vld [vmem:[#allocation3 + $0xa0] sm:$0xff]  ;;  %v143_v39 = vld [vmem:[#allocation3 + $0x98] sm:$0xff]  ;;  %v142_v40 = vld [vmem:[#allocation3 + $0x90] sm:$0xff] }
  0x17   :  { %166 = vmatpush.msra.mxu2 %v133_v22  ;;  %v141_v41 = vld [vmem:[#allocation3 + $0x88] sm:$0xff]  ;;  %v140_v42 = vld [vmem:[#allocation3 + $0x80] sm:$0xff]  ;;  %v223_v45 = vld [vmem:[%s564_s5 + $0x78] sm:$0xff]  ;;  %v404_v22 = vmov 0  }
  0x18   :  { %112 = vmatpush.msrb.mxu1 %v54_v19  ;;  %188 = vmatpush.msra.mxu3 %v150_v30  ;;  %v222_v46 = vld [vmem:[%s564_s5 + $0x70] sm:$0xff]  ;;  %v221_v47 = vld [vmem:[%s564_s5 + $0x68] sm:$0xff]  ;;  %v220_v50 = vld [vmem:[%s564_s5 + $0x60] sm:$0xff] }
  0x19   :  { %330 = vmatmul.msk.f32.gmra.mxu1 %vm67_vm0, %v52_v21  ;;  %167 = vmatpush.msra.mxu2 %v132_v23  ;;  %v219_v52 = vld [vmem:[%s564_s5 + $0x58] sm:$0xff]  ;;  %v218_v63 = vld [vmem:[%s564_s5 + $0x50] sm:$0xff]  ;;  %v217_v0 = vld [vmem:[%s564_s5 + $0x48] sm:$0xff] }
  0x1a   :  { %189 = vmatpush.msra.mxu3 %v149_v32  ;;  %228 = vmatpush.msra.mxu0 %v223_v45  ;;  %v216_v1 = vld [vmem:[%s564_s5 + $0x40] sm:$0xff]  ;;  %v215_v2 = vld [vmem:[%s564_s5 + $0x38] sm:$0xff]  ;;  %v214_v3 = vld [vmem:[%s564_s5 + $0x30] sm:$0xff] }
  0x1b   :  { %168 = vmatpush.msra.mxu2 %v131_v24  ;;  %v213_v4 = vld [vmem:[%s564_s5 + $0x28] sm:$0xff]  ;;  %v212_v5 = vld [vmem:[%s564_s5 + $0x20] sm:$0xff]  ;;  %v211_v6 = vld [vmem:[%s564_s5 + $0x18] sm:$0xff]  ;;  %342 = vset.pattern.permute.xlu0 %v404_v22 }
  0x1c   :  { %190 = vmatpush.msra.mxu3 %v148_v34  ;;  %229 = vmatpush.msra.mxu0 %v222_v46  ;;  %v209_v8 = vld [vmem:[%s564_s5 + $0x8] sm:$0xff]  ;;  %v208_v9 = vld [vmem:[%s564_s5] sm:$0xff] }
  0x1d   :  { %169 = vmatpush.msra.mxu2 %v130_v25  ;;  %v343_v11 = vld [vmem:[%s563_s4] ss:$0 sm:$0xff] }
  0x1e   :  { %191 = vmatpush.msra.mxu3 %v147_v35  ;;  %230 = vmatpush.msra.mxu0 %v221_v47  ;;  %v344_v24 = vld [vmem:[%s565_s6] ss:$0 sm:$0xff]  ;;  %s405_s6 = smov [#allocation6]  }
  0x1f   :  { %170 = vmatpush.msra.mxu2 %v129_v26  ;;  %v253_v30 = vld [vmem:[%s566_s7] sm:$0x1]  ;;  %s317_s22 = sshll.u32 %s405_s6, 4  ;;  %s318_s22 = int_to_ptr.vmem [resolvable:$true] %s317_s22 }
  0x20   :  { %192 = vmatpush.msra.mxu3 %v146_v36  ;;  %231 = vmatpush.msra.mxu0 %v220_v50 }
  0x21   :  { %331 = vmatmul.msk.f32.vlgmr.msrb.gmra.mxu1 %vm67_vm0, %v51_v7  ;;  %171 = vmatpush.msra.mxu2 %v128_v27  ;;  %v210_v7 = vld [vmem:[%s564_s5 + $0x10] sm:$0xff] }
  0x22   :  { %193 = vmatpush.msra.mxu3 %v145_v37  ;;  %232 = vmatpush.msra.mxu0 %v219_v52 }
  0x23   :  { %172 = vmatpush.msra.mxu2 %v127_v28 }
  0x24   :  { %194 = vmatpush.msra.mxu3 %v144_v38  ;;  %233 = vmatpush.msra.mxu0 %v218_v63 }
  0x25   :  { %173 = vmatpush.msra.mxu2 %v126_v29 }
  0x26   :  { %195 = vmatpush.msra.mxu3 %v143_v39  ;;  %234 = vmatpush.msra.mxu0 %v217_v0 }
  0x27   :  { %174 = vmatpush.msra.mxu2 %v125_v31 }
  0x28   :  { %196 = vmatpush.msra.mxu3 %v142_v40  ;;  %235 = vmatpush.msra.mxu0 %v216_v1 }
  0x29   :  { %332 = vmatmul.msk.f32.gmra.mxu1 %vm67_vm0, %v52_v21  ;;  %175 = vmatpush.msra.mxu2 %v124_v33  ;;  %v254_v21 = vld [vmem:[#allocation2] sm:$0x1] }
  0x2a   :  { %197 = vmatpush.msra.mxu3 %v141_v41  ;;  %236 = vmatpush.msra.mxu0 %v215_v2 }
  0x2b   :  { %257 = vperm.xlu0 %342, %v254_v21  }
  0x2c   :  { %198 = vmatpush.msra.mxu3 %v140_v42  ;;  %237 = vmatpush.msra.mxu0 %v214_v3 }
  0x2e   :  { %238 = vmatpush.msra.mxu0 %v213_v4 }
  0x30   :  { %239 = vmatpush.msra.mxu0 %v212_v5 }
  0x32   :  { %240 = vmatpush.msra.mxu0 %v211_v6 }
  0x34   :  { %241 = vmatpush.msra.mxu0 %v210_v7 }
  0x36   :  { %242 = vmatpush.msra.mxu0 %v209_v8 }
  0x38   :  { %243 = vmatpush.msra.mxu0 %v208_v9 }
  0x8e   :  { %v91_v48 = vpop.f32.mrf.mxu1 }
  0x8f   :  { %v92_v49 = vadd.f32 %v91_v48, %v63_v44 }
  0x91   :  { %v120_v51 = vmax.f32 %v92_v49, 0.0 }
  0x93   :  { %176 = vmatmul.f32.vlgmr.msra.gmra.mxu2 %v120_v51 }
  0x96   :  { %v94_v53 = vpop.f32.mrf.mxu1 }
  0x97   :  { %v95_v54 = vadd.f32 %v94_v53, %v63_v44 }
  0x99   :  { %v122_v55 = vmax.f32 %v95_v54, 0.0 }
  0x9b   :  { %179 = vmatmul.f32.gmra.mxu2 %v122_v55 }
  0x9d   :  { %v258_v31 = vpop.permute.xlu0 %257 }
  0x9e   :  { %v114_v57 = vpop.f32.mrf.mxu1  ;;  %v260_v32 = vperm.slane %v258_v31, 0 }
  0x9f   :  { %v115_v58 = vadd.f32 %v114_v57, %v64_v56 }
  0xa1   :  { %v121_v59 = vmax.f32 %v115_v58, 0.0 }
  0xa3   :  { %199 = vmatmul.f32.vlgmr.msra.gmra.mxu3 %v121_v59 }
  0xa6   :  { %v117_v60 = vpop.f32.mrf.mxu1 }
  0xa7   :  { %v118_v61 = vadd.f32 %v117_v60, %v64_v56 }
  0xa9   :  { %v123_v62 = vmax.f32 %v118_v61, 0.0 }
  0xab   :  { %202 = vmatmul.f32.gmra.mxu3 %v123_v62 }
 0x116   :  { %v177_v10 = vpop.f32.mrf.mxu2 }
 0x117   :  { %v178_v12 = vadd.f32 %v343_v11, %v177_v10 }
 0x11e   :  { %v180_v16 = vpop.f32.mrf.mxu2 }
 0x11f   :  { %v181_v17 = vadd.f32 %v343_v11, %v180_v16 }
 0x126   :  { %v200_v13 = vpop.f32.mrf.mxu3 }
 0x127   :  { %v201_v14 = vadd.f32 %v200_v13, %v178_v12 }
 0x129   :  { %v206_v15 = vmax.f32 %v201_v14, 0.0 }
 0x12b   :  { %244 = vmatmul.f32.vlgmr.msra.gmra.mxu0 %v206_v15 }
 0x12e   :  { %v203_v18 = vpop.f32.mrf.mxu3 }
 0x12f   :  { %v204_v19 = vadd.f32 %v203_v18, %v181_v17 }
 0x131   :  { %v207_v20 = vmax.f32 %v204_v19, 0.0 }
 0x133   :  { %247 = vmatmul.f32.gmra.mxu0 %v207_v20 }
 0x1a8   :  { %v245_v23 = vpop.f32.mrf.mxu0 }
 0x1a9   :  { %v246_v27 = vadd.f32 %v344_v24, %v245_v23 }
 0x1ab   :  { %v251_v29 = vmax.f32 %v246_v27, 0.0 }
 0x1b0   :  { %v248_v25 = vpop.f32.mrf.mxu0 }
 0x1b1   :  { %v249_v26 = vadd.f32 %v344_v24, %v248_v25 }
 0x1b3   :  { %v252_v28 = vmax.f32 %v249_v26, 0.0 }
 0x1b5   :  { %333 = vmatpush.xpose.msk.msra.mxu1 %vm261_vm1, %v252_v28 }
 0x1b9   :  { %334 = vmatpush.xpose.msk.msra.mxu1 %vm261_vm1, %v251_v29 }
 0x1bc   :  { %335 = vmatmul.msk.f32.vlgmr.msra.gmra.mxu1 %vm261_vm1, %v253_v30 }
 0x239   :  { %v288_v33 = vpop.f32.mrf.mxu1 }
 0x23a   :  { %v289_v34 = vadd.f32 %v288_v33, %v260_v32 }
 0x23c   :  { %v336_v35 = vmul.f32 -1.442695, %v289_v34 }
 0x23e   :  { %345 = vpow2.f32 %v336_v35 }
 0x244   :  { %v346_v36 = vpop.eup %345 }
 0x245   :  { %v294_v37 = vadd.f32 1.0, %v346_v36 }
 0x247   :  { %347 = vrcp.f32 %v294_v37  ;;  %v306_v41 = vand.u32 2147483648, %v294_v37  ;;  %v304_v43 = vand.u32 2147483647, %v294_v37  ;;  %vm300_vm3 = vweird.f32 %v294_v37 }
 0x249   :  { %v307_v45 = vor.u32 1.1754944e-38, %v306_v41  ;;  %vm305_vm6 = vcmp.eq.f32.partialorder %v304_v43, 8.507059e+37 }
 0x24d   :  { %v348_v38 = vpop.eup %347 }
 0x24e   :  { %v296_v39 = vmul.f32 %v348_v38, %v294_v37  ;;  %vm301_vm2 = vweird.f32 %v348_v38 }
 0x24f   :  { %vm302_vm4 = vmor %vm300_vm3, %vm301_vm2 }
 0x250   :  { %v297_v40 = vsub.f32 1.0, %v296_v39 }
 0x252   :  { %v298_v42 = vmul.f32 %v348_v38, %v297_v40 }
 0x254   :  { %v299_v44 = vadd.f32 %v348_v38, %v298_v42 }
 0x256   :  { %v303_v46 = vsel %vm302_vm4, %v348_v38, %v299_v44 }
 0x257   :  { %v308_v47 = vsel %vm305_vm6, %v307_v45, %v303_v46 }
 0x258   :  { %311 = vst.msk [vmem:[#allocation6] sm:$0x1] %vm310_vm5, %v308_v47 }
 0x259   :  { %322 = dma.vmem_to_hbm [thread:$0]  %s318_s22, 16, %s320_s24, [#allocation5]  }
 0x25a   :  { %399 = dma.done.wait [#allocation5], 16  }
 0x25b   :  { %400 = vsyncadd [#allocation5], 4294967280 }
 0x25c   :  { %327 = vsyncpa [#allocation4], 1 }
 0x25d   :  { %328 = vsyncpa [#allocation5], 1 }

</bundles_post_ra>
